<compile_context>
chip_gen: v6e
topology: v6e:2x2x1
jax: 0.10.0
libtpu: 0.0.40
codegen_flags: <defaults>
</compile_context>

<pallas_src>
import functools
import math

import jax
import jax.numpy as jnp
from jax.experimental import pallas as pl
from jax.experimental.pallas import tpu as pltpu


def _round_up(x, m):
    return (x + m - 1) // m * m


def _cdiv(a, b):
    return -(-a // b)


def _emd_loss_kernel(tri_ref, pred_ref, label_ref, out_ref, *, block_rows, valid_rows):
    # Upcast inside the kernel: bf16/f16 callers only pay native HBM->VMEM
    # bytes; for f32 inputs the astype is a no-op.
    diff = pred_ref[...].astype(jnp.float32) - label_ref[...].astype(jnp.float32)

    if valid_rows is not None:
        # Ragged grid tail: Pallas does NOT zero out-of-bounds block elements,
        # so zero rows past the true extent before the reduction.
        i = pl.program_id(0)
        row = jax.lax.broadcasted_iota(jnp.int32, diff.shape, 0) + i * block_rows
        diff = jnp.where(row < valid_rows, diff, 0.0)

    # Segmented (per original C-class group) inclusive cumulative sum,
    # expressed as diff @ tri with a block-diagonal upper-triangular 0/1
    # matrix that stays resident in VMEM (constant index_map input).
    # TODO(synk): on v5e a segmented Hillis-Steele lane scan (pltpu.roll by
    # 1/2/4/8 + hoisted lane masks) avoids the 64x MXU FLOP inflation; the
    # matmul form is kept here as the portable, guaranteed-lowering choice.
    seg_cumsum = jnp.dot(diff, tri_ref[...], preferred_element_type=jnp.float32)

    partial = jnp.sum(jnp.abs(seg_cumsum))
    # Lane-dense (1, 8, 128) tile store -> unmasked vst; wrapper reads [:, 0, 0].
    out_ref[...] = jnp.full(out_ref.shape, partial, dtype=out_ref.dtype)


def emd_loss(pred, label, max_block_rows=1024):
    assert pred.shape == label.shape and pred.ndim == 2
    B, C = pred.shape

    # Lane-dense packing: fold G consecutive batch rows into one W = G*C wide
    # row so the last (lane) dimension is a multiple of 128. For C=10: G=64,
    # W=640. The reshape is free (bitcast) on row-major data.
    G = 128 // math.gcd(C, 128)
    W = G * C

    # Only pad when the G-row fold needs it (<= G-1 rows; tiny inputs round up
    # to one full (8, W) tile). Large batches with B % G == 0 are copy-free:
    # the ragged grid tail is masked inside the kernel instead of padded.
    Bp = max(_round_up(B, G), 8 * G)
    if Bp != B:
        padding = ((0, Bp - B), (0, 0))
        pred = jnp.pad(pred, padding)   # zero rows contribute exactly 0
        label = jnp.pad(label, padding)

    R = Bp // G
    pred2 = pred.reshape(R, W)
    label2 = label.reshape(R, W)

    # Block sizing: multi-MiB per-input tiles amortize the ~0.35us per-step
    # overhead; keep ~4+ grid steps when possible for megacore sharding; cap
    # so (2 inputs x 2 buffers) + resident tri + matmul temporaries stay well
    # inside VMEM on every generation (v7x has only 64 MiB physical).
    block_rows = min(max_block_rows, max(8, _round_up(_cdiv(R, 4), 8)))
    block_rows = min(block_rows, R)
    num_tiles = _cdiv(R, block_rows)
    valid_rows = R if (R % block_rows) else None  # mask only when needed

    # Block-diagonal inclusive upper-triangular 0/1 matrix:
    # (x @ tri)[b, j] = sum_{k: k//C == j//C, k <= j} x[b, k].
    idx = jnp.arange(W)
    same_seg = (idx[:, None] // C) == (idx[None, :] // C)
    tri = jnp.where(same_seg & (idx[:, None] <= idx[None, :]), 1.0, 0.0).astype(
        jnp.float32
    )

    itemsize = jnp.dtype(pred.dtype).itemsize
    cost = pl.CostEstimate(
        flops=2 * Bp * C * C,                 # real algorithmic flops
        transcendentals=0,
        bytes_accessed=2 * Bp * C * itemsize + W * W * 4 + num_tiles * 8 * 128 * 4,
    )

    kernel = functools.partial(
        _emd_loss_kernel, block_rows=block_rows, valid_rows=valid_rows
    )

    partials = pl.pallas_call(
        kernel,
        out_shape=jax.ShapeDtypeStruct((num_tiles, 8, 128), jnp.float32),
        grid_spec=pltpu.PrefetchScalarGridSpec(
            num_scalar_prefetch=0,
            grid=(num_tiles,),
            in_specs=[
                # tri: same block every step -> stays resident, no re-DMA.
                pl.BlockSpec((W, W), lambda i: (0, 0)),
                pl.BlockSpec((block_rows, W), lambda i: (i, 0)),
                pl.BlockSpec((block_rows, W), lambda i: (i, 0)),
            ],
            out_specs=pl.BlockSpec((1, 8, 128), lambda i: (i, 0, 0)),
        ),
        compiler_params=pltpu.CompilerParams(
            dimension_semantics=("parallel",),
            # Above v5e's 16 MiB default scoped limit, well under v7x's 64 MiB
            # physical VMEM; actual working set is ~20 MiB at block_rows=1024.
            vmem_limit_bytes=40 * 1024 * 1024,
        ),
        cost_estimate=cost,
    )(tri, pred2, label2)

    # Tiny final reduction over per-tile partials (plain XLA).
    return jnp.sum(partials[:, 0, 0])


if __name__ == "__main__":
    key = jax.random.PRNGKey(0)

    def ref_loss(p, l):
        # Pure-JAX reference (same semantics as the PyTorch forward).
        return jnp.sum(jnp.abs(jnp.cumsum(p - l, axis=1)))

    C = 10
    # B=8: tiny-batch path (single (8, 640) tile). B=520: non-multiple-of-64
    # fold pad + multi-tile grid + in-kernel ragged-tail masking.
    for B in (8, 520):
        k1, k2, key = jax.random.split(key, 3)
        pred = jax.nn.softmax(jax.random.normal(k1, (B, C), dtype=jnp.float32), axis=1)
        label = jax.nn.softmax(jax.random.normal(k2, (B, C), dtype=jnp.float32), axis=1)

        loss = emd_loss(pred, label)
        jax.block_until_ready(loss)

        ref = ref_loss(pred, label)
        assert jnp.allclose(loss, ref, rtol=1e-5, atol=1e-5), (B, loss, ref)

    print("KERNEL_OK")
</pallas_src>

<mosaic_0001>
module attributes {stable_mosaic.version = 11 : i64} {
  func.func @_emd_loss_kernel(%arg0: i32, %arg1: memref<640x640xf32, #tpu.memory_space<vmem>>, %arg2: memref<8x640xf32, #tpu.memory_space<vmem>>, %arg3: memref<8x640xf32, #tpu.memory_space<vmem>>, %arg4: memref<1x8x128xf32, #tpu.memory_space<vmem>>) attributes {dimension_semantics = [#tpu.dimension_semantics<parallel>], iteration_bounds = array<i64: 1>, scalar_prefetch = 0 : i64, scratch_operands = 0 : i64, tpu.core_type = #tpu.core_type<tc>, window_params = [{pipeline_mode = #tpu.pipeline_mode<synchronous>, transform_indices = @transform_0, window_bounds = array<i64: 640, 640>}, {transform_indices = @transform_1, window_bounds = array<i64: 8, 640>}, {transform_indices = @transform_2, window_bounds = array<i64: 8, 640>}, {transform_indices = @transform_3, window_bounds = array<i64: 1, 8, 128>}]} {
    %c0 = arith.constant 0 : index
    %c0_0 = arith.constant 0 : index
    %0 = vector.load %arg2[%c0, %c0_0] : memref<8x640xf32, #tpu.memory_space<vmem>>, vector<8x640xf32>
    %c0_1 = arith.constant 0 : index
    %c0_2 = arith.constant 0 : index
    %1 = vector.load %arg3[%c0_1, %c0_2] : memref<8x640xf32, #tpu.memory_space<vmem>>, vector<8x640xf32>
    %2 = arith.subf %0, %1 : vector<8x640xf32>
    %c0_3 = arith.constant 0 : index
    %c0_4 = arith.constant 0 : index
    %3 = vector.load %arg1[%c0_3, %c0_4] : memref<640x640xf32, #tpu.memory_space<vmem>>, vector<640x640xf32>
    %cst = arith.constant dense<0.000000e+00> : vector<8x640xf32>
    %4 = tpu.matmul %2, %3, %cst {dimension_numbers = #tpu.dot_dimension_numbers<[1], [0], [0], [1], [0, 0, 1, 1], [], []>} : vector<8x640xf32>, vector<640x640xf32>, vector<8x640xf32> -> vector<8x640xf32>
    %5 = math.absf %4 : vector<8x640xf32>
    %6 = vector.shape_cast %5 : vector<8x640xf32> to vector<1x8x640xf32>
    %cst_5 = arith.constant dense<0.000000e+00> : vector<1xf32>
    %7 = vector.multi_reduction <add>, %6, %cst_5 [1, 2] : vector<1x8x640xf32> to vector<1xf32>
    %8 = vector.shape_cast %7 : vector<1xf32> to vector<1x1x1xf32>
    %9 = vector.extract %8[0, 0, 0] : f32 from vector<1x1x1xf32>
    %10 = vector.broadcast %9 : f32 to vector<1x8x128xf32>
    %c0_6 = arith.constant 0 : index
    %c0_7 = arith.constant 0 : index
    %c0_8 = arith.constant 0 : index
    %11 = vector.load %arg4[%c0_6, %c0_7, %c0_8] : memref<1x8x128xf32, #tpu.memory_space<vmem>>, vector<1x8x128xf32>
    tpu.vector_store %arg4[%c0_6, %c0_7, %c0_8], %10 {strides = array<i32>} : memref<1x8x128xf32, #tpu.memory_space<vmem>>, vector<1x8x128xf32>,
    return
  }
  func.func @transform_0(%arg0: i32) -> (i32, i32) {
    %c0_i32 = arith.constant 0 : i32
    %c0_i32_0 = arith.constant 0 : i32
    %c0_i32_1 = arith.constant 0 : i32
    return %c0_i32, %c0_i32_0 : i32, i32
  }
  func.func @transform_1(%arg0: i32) -> (i32, i32) {
    %c0_i32 = arith.constant 0 : i32
    %c0_i32_0 = arith.constant 0 : i32
    return %arg0, %c0_i32 : i32, i32
  }
  func.func @transform_2(%arg0: i32) -> (i32, i32) {
    %c0_i32 = arith.constant 0 : i32
    %c0_i32_0 = arith.constant 0 : i32
    return %arg0, %c0_i32 : i32, i32
  }
  func.func @transform_3(%arg0: i32) -> (i32, i32, i32) {
    %c0_i32 = arith.constant 0 : i32
    %c0_i32_0 = arith.constant 0 : i32
    %c0_i32_1 = arith.constant 0 : i32
    return %arg0, %c0_i32, %c0_i32_0 : i32, i32, i32
  }
}

</mosaic_0001>

<bundles_post_ra>
// kernel: tpu_custom_call.1
= control target key start
LH: loop header
LB: loop body
LE: loop exit
PB: predicated region body
PF: predicated region fallthrough
CT: control target
= control target key end

     0   :  { %8 = vsyncpa [#allocation3], 0  ;;  %s1441_s0 = inlined_call_operand.hbm [shape: f32[640,640], index: 0, kind: input, shape index: {}]   ;;  %s1442_s1 = inlined_call_operand.hbm [shape: f32[8,640], index: 1, kind: input, shape index: {}]   ;;  %s1443_s2 = inlined_call_operand.hbm [shape: f32[8,640], index: 2, kind: input, shape index: {}]   ;;  %s1444_s3 = inlined_call_operand.hbm [shape: f32[1,8,128], index: 3, kind: output, shape index: {}]  }
   0x1   :  { %9 = vsyncpa [#allocation6], 0 }
   0x2   :  { %10 = vsyncpa [#allocation4], 0  ;;  %s1357_s12 = smov [#allocation5]   ;;  %s1358_s14 = smov [#allocation2]  }
   0x3   :  { %s29_s13 = sshll.u32 %s1357_s12, 4  ;;  %s16_s15 = sshll.u32 %s1358_s14, 4  ;;  %s30_s13 = int_to_ptr.vmem [resolvable:$true] %s29_s13  ;;  %s17_s15 = int_to_ptr.vmem [resolvable:$true] %s16_s15 }
   0x4   :  { %s1279_s16 = scalar_lea.vmem %s30_s13, 640  ;;  %p1284_p1 = scmp.lt.s32.totalorder %s30_s13, %s30_s13 }
   0x5   :  { %p1280_p0 = scmp.ne.s32.totalorder %s30_s13, %s1279_s16  ;;  %p1285_p2 = scmp.lt.s32.totalorder %s1279_s16, %s1279_s16 }
   0x7   :  { %p1286_p3 = por %p1285_p2, %p1284_p1 }
   0x9   :  { %p1287_p4 = pnand %p1286_p3, %p1280_p0 }
   0xb   :  { %1290 = shalt.err (!%p1287_p4)
}
   0xc   :  { %32 = dma.hbm_to_vmem [thread:$0]  %s1442_s1, 640, %s30_s13, [#allocation6]  }
   0xd   :  { %s1299_s19 = scalar_lea.vmem %s17_s15, 51200  ;;  %p1304_p6 = scmp.lt.s32.totalorder %s17_s15, %s17_s15 }
   0xe   :  { %p1300_p5 = scmp.ne.s32.totalorder %s17_s15, %s1299_s19  ;;  %p1305_p7 = scmp.lt.s32.totalorder %s1299_s19, %s1299_s19 }
  0x10   :  { %p1306_p8 = por %p1305_p7, %p1304_p6 }
  0x12   :  { %p1307_p9 = pnand %p1306_p8, %p1300_p5 }
  0x14   :  { %1310 = shalt.err (!%p1307_p9)
}
  0x15   :  { %s1359_s20 = smov 640   ;;  %s1360_s21 = smov 40  }
  0x16   :  { %22 = dma.hbm_to_vmem [thread:$0]  %s1441_s0, 51200, %s17_s15, [#allocation3], %s1359_s20, %s1359_s20, %s1360_s21  }
  0x17   :  { %s1361_s24 = smov [#allocation7]  }
  0x18   :  { %s39_s25 = sshll.u32 %s1361_s24, 4  ;;  %s40_s25 = int_to_ptr.vmem [resolvable:$true] %s39_s25 }
  0x19   :  { %s1319_s26 = scalar_lea.vmem %s40_s25, 640  ;;  %p1324_p11 = scmp.lt.s32.totalorder %s40_s25, %s40_s25 }
  0x1a   :  { %p1320_p10 = scmp.ne.s32.totalorder %s40_s25, %s1319_s26  ;;  %p1325_p12 = scmp.lt.s32.totalorder %s1319_s26, %s1319_s26 }
  0x1c   :  { %p1326_p13 = por %p1325_p12, %p1324_p11 }
  0x1e   :  { %p1327_p0 = pnand %p1326_p13, %p1320_p10 }
  0x20   :  { %1330 = shalt.err (!%p1327_p0)
}
  0x21   :  { %42 = dma.hbm_to_vmem [thread:$0]  %s1443_s2, 640, %s40_s25, [#allocation6]  }
  0x22   :  { %1351 = dma.done.wait [#allocation3], 51200  }
  0x23   :  { %1352 = vsyncadd [#allocation3], 4294916096 }
  0x24   :  { %1353 = dma.done.wait [#allocation6], 1280  }
  0x25   :  { %1354 = vsyncadd [#allocation6], 4294966016  ;;  %v143_v0 = vld [vmem:[#allocation2 + $0x260] sm:$0xff]  ;;  %v142_v2 = vld [vmem:[#allocation2 + $0x258] sm:$0xff]  ;;  %vm1363_vm0 = vmmov 0   ;;  %s1364_s0 = smov [#allocation8]  }
  0x26   :  { %v303_v1 = vld [vmem:[#allocation2 + $0x760] sm:$0xff]  ;;  %467 = vmatprep.subr.mxu0 %v143_v0  ;;  %v302_v3 = vld [vmem:[#allocation2 + $0x758] sm:$0xff]  ;;  %v137_v6 = vld [vmem:[#allocation2 + $0x230] sm:$0xff]  ;;  %s1129_s2 = sshll.u32 %s1364_s0, 4  ;;  %s1130_s2 = int_to_ptr.vmem [resolvable:$true] %s1129_s2 }
  0x27   :  { %538 = vmatprep.subr.mxu1 %v303_v1  ;;  %v138_v4 = vld [vmem:[#allocation2 + $0x238] sm:$0xff]  ;;  %468 = vmatpush1.msra.mxu0 %v142_v2  ;;  %v297_v7 = vld [vmem:[#allocation2 + $0x730] sm:$0xff]  ;;  %v132_v10 = vld [vmem:[#allocation2 + $0x208] sm:$0xff]  ;;  %s1331_s29 = scalar_lea.vmem %s1130_s2, 128  ;;  %p1336_p2 = scmp.lt.s32.totalorder %s1130_s2, %s1130_s2 }
  0x28   :  { %v298_v5 = vld [vmem:[#allocation2 + $0x738] sm:$0xff]  ;;  %539 = vmatpush1.msra.mxu1 %v302_v3  ;;  %v133_v8 = vld [vmem:[#allocation2 + $0x210] sm:$0xff]  ;;  %469 = vmatprep.subr.mxu0 %v138_v4  ;;  %v292_v11 = vld [vmem:[#allocation2 + $0x708] sm:$0xff]  ;;  %p1332_p1 = scmp.ne.s32.totalorder %s1130_s2, %s1331_s29  ;;  %p1337_p3 = scmp.lt.s32.totalorder %s1331_s29, %s1331_s29 }
  0x29   :  { %540 = vmatprep.subr.mxu1 %v298_v5  ;;  %v293_v9 = vld [vmem:[#allocation2 + $0x710] sm:$0xff]  ;;  %470 = vmatpush1.msra.mxu0 %v137_v6  ;;  %v128_v12 = vld [vmem:[#allocation2 + $0x1e8] sm:$0xff]  ;;  %v127_v14 = vld [vmem:[#allocation2 + $0x1e0] sm:$0xff] }
  0x2a   :  { %541 = vmatpush1.msra.mxu1 %v297_v7  ;;  %v288_v13 = vld [vmem:[#allocation2 + $0x6e8] sm:$0xff]  ;;  %471 = vmatprep.subr.mxu0 %v133_v8  ;;  %v287_v15 = vld [vmem:[#allocation2 + $0x6e0] sm:$0xff]  ;;  %v122_v18 = vld [vmem:[#allocation2 + $0x1b8] sm:$0xff]  ;;  %p1338_p4 = por %p1337_p3, %p1336_p2 }
  0x2b   :  { %542 = vmatprep.subr.mxu1 %v293_v9  ;;  %472 = vmatpush1.msra.mxu0 %v132_v10  ;;  %v123_v16 = vld [vmem:[#allocation2 + $0x1c0] sm:$0xff]  ;;  %v282_v19 = vld [vmem:[#allocation2 + $0x6b8] sm:$0xff]  ;;  %v117_v22 = vld [vmem:[#allocation2 + $0x190] sm:$0xff] }
  0x2c   :  { %543 = vmatpush1.msra.mxu1 %v292_v11  ;;  %v283_v17 = vld [vmem:[#allocation2 + $0x6c0] sm:$0xff]  ;;  %473 = vmatprep.subr.mxu0 %v128_v12  ;;  %v118_v20 = vld [vmem:[#allocation2 + $0x198] sm:$0xff]  ;;  %v277_v23 = vld [vmem:[#allocation2 + $0x690] sm:$0xff]  ;;  %p1339_p5 = pnand %p1338_p4, %p1332_p1 }
  0x2d   :  { %544 = vmatprep.subr.mxu1 %v288_v13  ;;  %474 = vmatpush1.msra.mxu0 %v127_v14  ;;  %v278_v21 = vld [vmem:[#allocation2 + $0x698] sm:$0xff]  ;;  %v113_v24 = vld [vmem:[#allocation2 + $0x170] sm:$0xff]  ;;  %v112_v26 = vld [vmem:[#allocation2 + $0x168] sm:$0xff] }
  0x2e   :  { %545 = vmatpush1.msra.mxu1 %v287_v15  ;;  %475 = vmatprep.subr.mxu0 %v123_v16  ;;  %v273_v25 = vld [vmem:[#allocation2 + $0x670] sm:$0xff]  ;;  %v272_v27 = vld [vmem:[#allocation2 + $0x668] sm:$0xff]  ;;  %v107_v30 = vld [vmem:[#allocation2 + $0x140] sm:$0xff] }
  0x2f   :  { %546 = vmatprep.subr.mxu1 %v283_v17  ;;  %476 = vmatpush1.msra.mxu0 %v122_v18  ;;  %v108_v28 = vld [vmem:[#allocation2 + $0x148] sm:$0xff]  ;;  %v267_v31 = vld [vmem:[#allocation2 + $0x640] sm:$0xff]  ;;  %v102_v34 = vld [vmem:[#allocation2 + $0x118] sm:$0xff] }
  0x30   :  { %547 = vmatpush1.msra.mxu1 %v282_v19  ;;  %477 = vmatprep.subr.mxu0 %v118_v20  ;;  %v268_v29 = vld [vmem:[#allocation2 + $0x648] sm:$0xff]  ;;  %v103_v32 = vld [vmem:[#allocation2 + $0x120] sm:$0xff]  ;;  %v262_v35 = vld [vmem:[#allocation2 + $0x618] sm:$0xff] }
  0x31   :  { %548 = vmatprep.subr.mxu1 %v278_v21  ;;  %478 = vmatpush1.msra.mxu0 %v117_v22  ;;  %v263_v33 = vld [vmem:[#allocation2 + $0x620] sm:$0xff]  ;;  %v98_v36 = vld [vmem:[#allocation2 + $0xf8] sm:$0xff]  ;;  %v97_v38 = vld [vmem:[#allocation2 + $0xf0] sm:$0xff] }
  0x32   :  { %549 = vmatpush1.msra.mxu1 %v277_v23  ;;  %479 = vmatprep.subr.mxu0 %v113_v24  ;;  %v258_v37 = vld [vmem:[#allocation2 + $0x5f8] sm:$0xff]  ;;  %v257_v39 = vld [vmem:[#allocation2 + $0x5f0] sm:$0xff]  ;;  %v92_v42 = vld [vmem:[#allocation2 + $0xc8] sm:$0xff] }
  0x33   :  { %550 = vmatprep.subr.mxu1 %v273_v25  ;;  %480 = vmatpush1.msra.mxu0 %v112_v26  ;;  %v93_v40 = vld [vmem:[#allocation2 + $0xd0] sm:$0xff]  ;;  %v252_v43 = vld [vmem:[#allocation2 + $0x5c8] sm:$0xff]  ;;  %v87_v46 = vld [vmem:[#allocation2 + $0xa0] sm:$0xff] }
  0x34   :  { %551 = vmatpush1.msra.mxu1 %v272_v27  ;;  %481 = vmatprep.subr.mxu0 %v108_v28  ;;  %v253_v41 = vld [vmem:[#allocation2 + $0x5d0] sm:$0xff]  ;;  %v88_v44 = vld [vmem:[#allocation2 + $0xa8] sm:$0xff]  ;;  %v247_v47 = vld [vmem:[#allocation2 + $0x5a0] sm:$0xff] }
  0x35   :  { %552 = vmatprep.subr.mxu1 %v268_v29  ;;  %482 = vmatpush1.msra.mxu0 %v107_v30  ;;  %v248_v45 = vld [vmem:[#allocation2 + $0x5a8] sm:$0xff]  ;;  %v83_v48 = vld [vmem:[#allocation2 + $0x80] sm:$0xff]  ;;  %v82_v50 = vld [vmem:[#allocation2 + $0x78] sm:$0xff] }
  0x36   :  { %553 = vmatpush1.msra.mxu1 %v267_v31  ;;  %483 = vmatprep.subr.mxu0 %v103_v32  ;;  %v243_v49 = vld [vmem:[#allocation2 + $0x580] sm:$0xff]  ;;  %v242_v51 = vld [vmem:[#allocation2 + $0x578] sm:$0xff]  ;;  %v77_v54 = vld [vmem:[#allocation2 + $0x50] sm:$0xff] }
  0x37   :  { %554 = vmatprep.subr.mxu1 %v263_v33  ;;  %484 = vmatpush1.msra.mxu0 %v102_v34  ;;  %v78_v52 = vld [vmem:[#allocation2 + $0x58] sm:$0xff]  ;;  %v237_v55 = vld [vmem:[#allocation2 + $0x550] sm:$0xff]  ;;  %v72_v58 = vld [vmem:[#allocation2 + $0x28] sm:$0xff] }
  0x38   :  { %555 = vmatpush1.msra.mxu1 %v262_v35  ;;  %485 = vmatprep.subr.mxu0 %v98_v36  ;;  %v238_v53 = vld [vmem:[#allocation2 + $0x558] sm:$0xff]  ;;  %v73_v56 = vld [vmem:[#allocation2 + $0x30] sm:$0xff]  ;;  %v232_v59 = vld [vmem:[#allocation2 + $0x528] sm:$0xff] }
  0x39   :  { %556 = vmatprep.subr.mxu1 %v258_v37  ;;  %486 = vmatpush1.msra.mxu0 %v97_v38  ;;  %v233_v57 = vld [vmem:[#allocation2 + $0x530] sm:$0xff]  ;;  %v68_v60 = vld [vmem:[#allocation2 + $0x8] sm:$0xff]  ;;  %v67_v62 = vld [vmem:[#allocation2] sm:$0xff] }
  0x3a   :  { %557 = vmatpush1.msra.mxu1 %v257_v39  ;;  %487 = vmatprep.subr.mxu0 %v93_v40  ;;  %v228_v61 = vld [vmem:[#allocation2 + $0x508] sm:$0xff]  ;;  %v227_v63 = vld [vmem:[#allocation2 + $0x500] sm:$0xff]  ;;  %v222_v2 = vld [vmem:[#allocation2 + $0x4d8] sm:$0xff] }
  0x3b   :  { %558 = vmatprep.subr.mxu1 %v253_v41  ;;  %488 = vmatpush1.msra.mxu0 %v92_v42  ;;  %v223_v0 = vld [vmem:[#allocation2 + $0x4e0] sm:$0xff]  ;;  %v382_v3 = vld [vmem:[#allocation2 + $0x9d8] sm:$0xff]  ;;  %v217_v6 = vld [vmem:[#allocation2 + $0x4b0] sm:$0xff] }
  0x3c   :  { %559 = vmatpush1.msra.mxu1 %v252_v43  ;;  %489 = vmatprep.subr.mxu0 %v88_v44  ;;  %v383_v1 = vld [vmem:[#allocation2 + $0x9e0] sm:$0xff]  ;;  %v218_v4 = vld [vmem:[#allocation2 + $0x4b8] sm:$0xff]  ;;  %v377_v7 = vld [vmem:[#allocation2 + $0x9b0] sm:$0xff] }
  0x3d   :  { %560 = vmatprep.subr.mxu1 %v248_v45  ;;  %490 = vmatpush1.msra.mxu0 %v87_v46  ;;  %v378_v5 = vld [vmem:[#allocation2 + $0x9b8] sm:$0xff]  ;;  %v213_v8 = vld [vmem:[#allocation2 + $0x490] sm:$0xff]  ;;  %v212_v10 = vld [vmem:[#allocation2 + $0x488] sm:$0xff] }
  0x3e   :  { %561 = vmatpush1.msra.mxu1 %v247_v47  ;;  %491 = vmatprep.subr.mxu0 %v83_v48  ;;  %v373_v9 = vld [vmem:[#allocation2 + $0x990] sm:$0xff]  ;;  %v372_v11 = vld [vmem:[#allocation2 + $0x988] sm:$0xff]  ;;  %v207_v14 = vld [vmem:[#allocation2 + $0x460] sm:$0xff] }
  0x3f   :  { %562 = vmatprep.subr.mxu1 %v243_v49  ;;  %492 = vmatpush1.msra.mxu0 %v82_v50  ;;  %v208_v12 = vld [vmem:[#allocation2 + $0x468] sm:$0xff]  ;;  %v367_v15 = vld [vmem:[#allocation2 + $0x960] sm:$0xff]  ;;  %v202_v18 = vld [vmem:[#allocation2 + $0x438] sm:$0xff] }
  0x40   :  { %563 = vmatpush1.msra.mxu1 %v242_v51  ;;  %493 = vmatprep.subr.mxu0 %v78_v52  ;;  %v368_v13 = vld [vmem:[#allocation2 + $0x968] sm:$0xff]  ;;  %v203_v16 = vld [vmem:[#allocation2 + $0x440] sm:$0xff]  ;;  %v362_v19 = vld [vmem:[#allocation2 + $0x938] sm:$0xff] }
  0x41   :  { %564 = vmatprep.subr.mxu1 %v238_v53  ;;  %494 = vmatpush1.msra.mxu0 %v77_v54  ;;  %v363_v17 = vld [vmem:[#allocation2 + $0x940] sm:$0xff]  ;;  %v198_v20 = vld [vmem:[#allocation2 + $0x418] sm:$0xff]  ;;  %v197_v22 = vld [vmem:[#allocation2 + $0x410] sm:$0xff] }
  0x42   :  { %565 = vmatpush1.msra.mxu1 %v237_v55  ;;  %495 = vmatprep.subr.mxu0 %v73_v56  ;;  %v358_v21 = vld [vmem:[#allocation2 + $0x918] sm:$0xff]  ;;  %v357_v23 = vld [vmem:[#allocation2 + $0x910] sm:$0xff]  ;;  %v192_v26 = vld [vmem:[#allocation2 + $0x3e8] sm:$0xff] }
  0x43   :  { %566 = vmatprep.subr.mxu1 %v233_v57  ;;  %496 = vmatpush1.msra.mxu0 %v72_v58  ;;  %v193_v24 = vld [vmem:[#allocation2 + $0x3f0] sm:$0xff]  ;;  %v352_v27 = vld [vmem:[#allocation2 + $0x8e8] sm:$0xff]  ;;  %v187_v30 = vld [vmem:[#allocation2 + $0x3c0] sm:$0xff] }
  0x44   :  { %567 = vmatpush1.msra.mxu1 %v232_v59  ;;  %497 = vmatprep.subr.mxu0 %v68_v60  ;;  %v353_v25 = vld [vmem:[#allocation2 + $0x8f0] sm:$0xff]  ;;  %v188_v28 = vld [vmem:[#allocation2 + $0x3c8] sm:$0xff]  ;;  %v347_v31 = vld [vmem:[#allocation2 + $0x8c0] sm:$0xff] }
  0x45   :  { %568 = vmatprep.subr.mxu1 %v228_v61  ;;  %498 = vmatpush1.msra.mxu0 %v67_v62  ;;  %v348_v29 = vld [vmem:[#allocation2 + $0x8c8] sm:$0xff]  ;;  %v183_v32 = vld [vmem:[#allocation2 + $0x3a0] sm:$0xff]  ;;  %v182_v34 = vld [vmem:[#allocation2 + $0x398] sm:$0xff] }
  0x46   :  { %569 = vmatpush1.msra.mxu1 %v227_v63  ;;  %499 = vmatprep.subr.mxu0 %v223_v0  ;;  %v343_v33 = vld [vmem:[#allocation2 + $0x8a0] sm:$0xff]  ;;  %v342_v35 = vld [vmem:[#allocation2 + $0x898] sm:$0xff]  ;;  %v177_v38 = vld [vmem:[#allocation2 + $0x370] sm:$0xff] }
  0x47   :  { %570 = vmatprep.subr.mxu1 %v383_v1  ;;  %500 = vmatpush2.msra.mxu0 %v222_v2  ;;  %v178_v36 = vld [vmem:[#allocation2 + $0x378] sm:$0xff]  ;;  %v337_v39 = vld [vmem:[#allocation2 + $0x870] sm:$0xff]  ;;  %v172_v42 = vld [vmem:[#allocation2 + $0x348] sm:$0xff] }
  0x48   :  { %571 = vmatpush2.msra.mxu1 %v382_v3  ;;  %501 = vmatprep.subr.mxu0 %v218_v4  ;;  %v338_v37 = vld [vmem:[#allocation2 + $0x878] sm:$0xff]  ;;  %v173_v40 = vld [vmem:[#allocation2 + $0x350] sm:$0xff]  ;;  %v332_v43 = vld [vmem:[#allocation2 + $0x848] sm:$0xff] }
  0x49   :  { %572 = vmatprep.subr.mxu1 %v378_v5  ;;  %502 = vmatpush2.msra.mxu0 %v217_v6  ;;  %v333_v41 = vld [vmem:[#allocation2 + $0x850] sm:$0xff]  ;;  %v168_v44 = vld [vmem:[#allocation2 + $0x328] sm:$0xff]  ;;  %v167_v46 = vld [vmem:[#allocation2 + $0x320] sm:$0xff] }
  0x4a   :  { %573 = vmatpush2.msra.mxu1 %v377_v7  ;;  %503 = vmatprep.subr.mxu0 %v213_v8  ;;  %v328_v45 = vld [vmem:[#allocation2 + $0x828] sm:$0xff]  ;;  %v327_v47 = vld [vmem:[#allocation2 + $0x820] sm:$0xff]  ;;  %v162_v50 = vld [vmem:[#allocation2 + $0x2f8] sm:$0xff] }
  0x4b   :  { %574 = vmatprep.subr.mxu1 %v373_v9  ;;  %504 = vmatpush2.msra.mxu0 %v212_v10  ;;  %v163_v48 = vld [vmem:[#allocation2 + $0x300] sm:$0xff]  ;;  %v322_v51 = vld [vmem:[#allocation2 + $0x7f8] sm:$0xff]  ;;  %v157_v54 = vld [vmem:[#allocation2 + $0x2d0] sm:$0xff] }
  0x4c   :  { %575 = vmatpush2.msra.mxu1 %v372_v11  ;;  %505 = vmatprep.subr.mxu0 %v208_v12  ;;  %v323_v49 = vld [vmem:[#allocation2 + $0x800] sm:$0xff]  ;;  %v158_v52 = vld [vmem:[#allocation2 + $0x2d8] sm:$0xff]  ;;  %v317_v55 = vld [vmem:[#allocation2 + $0x7d0] sm:$0xff] }
  0x4d   :  { %576 = vmatprep.subr.mxu1 %v368_v13  ;;  %506 = vmatpush2.msra.mxu0 %v207_v14  ;;  %v318_v53 = vld [vmem:[#allocation2 + $0x7d8] sm:$0xff]  ;;  %v153_v56 = vld [vmem:[#allocation2 + $0x2b0] sm:$0xff]  ;;  %v152_v58 = vld [vmem:[#allocation2 + $0x2a8] sm:$0xff] }
  0x4e   :  { %577 = vmatpush2.msra.mxu1 %v367_v15  ;;  %507 = vmatprep.subr.mxu0 %v203_v16  ;;  %v313_v57 = vld [vmem:[#allocation2 + $0x7b0] sm:$0xff]  ;;  %v312_v59 = vld [vmem:[#allocation2 + $0x7a8] sm:$0xff]  ;;  %v55_v62 = vld [vmem:[#allocation5 + $0x18] sm:$0xff] }
  0x4f   :  { %578 = vmatprep.subr.mxu1 %v363_v17  ;;  %508 = vmatpush2.msra.mxu0 %v202_v18  ;;  %v53_v60 = vld [vmem:[#allocation5 + $0x8] sm:$0xff]  ;;  %v58_v61 = vld [vmem:[#allocation7 + $0x8] sm:$0xff]  ;;  %v60_v63 = vld [vmem:[#allocation7 + $0x18] sm:$0xff] }
  0x50   :  { %579 = vmatpush2.msra.mxu1 %v362_v19  ;;  %509 = vmatprep.subr.mxu0 %v198_v20  ;;  %v52_v0 = vld [vmem:[#allocation5] sm:$0xff]  ;;  %v57_v1 = vld [vmem:[#allocation7] sm:$0xff]  ;;  %v54_v2 = vld [vmem:[#allocation5 + $0x10] sm:$0xff]  ;;  %v1394_v6 = vsub.f32 %v53_v60, %v58_v61  ;;  %v1396_v8 = vsub.f32 %v55_v62, %v60_v63 }
  0x51   :  { %580 = vmatprep.subr.mxu1 %v358_v21  ;;  %510 = vmatpush2.msra.mxu0 %v197_v22  ;;  %v59_v3 = vld [vmem:[#allocation7 + $0x10] sm:$0xff]  ;;  %v148_v4 = vld [vmem:[#allocation2 + $0x288] sm:$0xff]  ;;  %v147_v7 = vld [vmem:[#allocation2 + $0x280] sm:$0xff]  ;;  %v1398_v10 = vsub.f32 %v52_v0, %v57_v1 }
  0x52   :  { %581 = vmatpush2.msra.mxu1 %v357_v23  ;;  %511 = vmatprep.subr.mxu0 %v193_v24  ;;  %v308_v5 = vld [vmem:[#allocation2 + $0x788] sm:$0xff]  ;;  %v307_v9 = vld [vmem:[#allocation2 + $0x780] sm:$0xff]  ;;  %v1400_v11 = vsub.f32 %v54_v2, %v59_v3  ;;  %v145_v13 = vld [vmem:[#allocation2 + $0x270] sm:$0xff] }
  0x53   :  { %582 = vmatprep.subr.mxu1 %v353_v25  ;;  %512 = vmatpush2.msra.mxu0 %v192_v26  ;;  %v463_v12 = vld [vmem:[#allocation2 + $0xc60] sm:$0xff]  ;;  %v462_v14 = vld [vmem:[#allocation2 + $0xc58] sm:$0xff]  ;;  %v144_v15 = vld [vmem:[#allocation2 + $0x268] sm:$0xff] }
  0x54   :  { %583 = vmatpush2.msra.mxu1 %v352_v27  ;;  %513 = vmatprep.subr.mxu0 %v188_v28  ;;  %v458_v16 = vld [vmem:[#allocation2 + $0xc38] sm:$0xff]  ;;  %v140_v17 = vld [vmem:[#allocation2 + $0x248] sm:$0xff]  ;;  %v457_v18 = vld [vmem:[#allocation2 + $0xc30] sm:$0xff] }
  0x55   :  { %584 = vmatprep.subr.mxu1 %v348_v29  ;;  %514 = vmatpush2.msra.mxu0 %v187_v30  ;;  %v139_v19 = vld [vmem:[#allocation2 + $0x240] sm:$0xff]  ;;  %v453_v20 = vld [vmem:[#allocation2 + $0xc10] sm:$0xff]  ;;  %v452_v22 = vld [vmem:[#allocation2 + $0xc08] sm:$0xff] }
  0x56   :  { %585 = vmatpush2.msra.mxu1 %v347_v31  ;;  %515 = vmatprep.subr.mxu0 %v183_v32  ;;  %v135_v21 = vld [vmem:[#allocation2 + $0x220] sm:$0xff]  ;;  %v134_v23 = vld [vmem:[#allocation2 + $0x218] sm:$0xff]  ;;  %v448_v24 = vld [vmem:[#allocation2 + $0xbe8] sm:$0xff] }
  0x57   :  { %586 = vmatprep.subr.mxu1 %v343_v33  ;;  %516 = vmatpush2.msra.mxu0 %v182_v34  ;;  %v130_v25 = vld [vmem:[#allocation2 + $0x1f8] sm:$0xff]  ;;  %v447_v26 = vld [vmem:[#allocation2 + $0xbe0] sm:$0xff]  ;;  %v129_v27 = vld [vmem:[#allocation2 + $0x1f0] sm:$0xff] }
  0x58   :  { %587 = vmatpush2.msra.mxu1 %v342_v35  ;;  %517 = vmatprep.subr.mxu0 %v178_v36  ;;  %v443_v28 = vld [vmem:[#allocation2 + $0xbc0] sm:$0xff]  ;;  %v125_v29 = vld [vmem:[#allocation2 + $0x1d0] sm:$0xff]  ;;  %v442_v30 = vld [vmem:[#allocation2 + $0xbb8] sm:$0xff] }
  0x59   :  { %588 = vmatprep.subr.mxu1 %v338_v37  ;;  %518 = vmatpush2.msra.mxu0 %v177_v38  ;;  %v124_v31 = vld [vmem:[#allocation2 + $0x1c8] sm:$0xff]  ;;  %v438_v32 = vld [vmem:[#allocation2 + $0xb98] sm:$0xff]  ;;  %v437_v34 = vld [vmem:[#allocation2 + $0xb90] sm:$0xff] }
  0x5a   :  { %589 = vmatpush2.msra.mxu1 %v337_v39  ;;  %519 = vmatprep.subr.mxu0 %v173_v40  ;;  %v120_v33 = vld [vmem:[#allocation2 + $0x1a8] sm:$0xff]  ;;  %v119_v35 = vld [vmem:[#allocation2 + $0x1a0] sm:$0xff]  ;;  %v433_v36 = vld [vmem:[#allocation2 + $0xb70] sm:$0xff] }
  0x5b   :  { %590 = vmatprep.subr.mxu1 %v333_v41  ;;  %520 = vmatpush2.msra.mxu0 %v172_v42  ;;  %v115_v37 = vld [vmem:[#allocation2 + $0x180] sm:$0xff]  ;;  %v432_v38 = vld [vmem:[#allocation2 + $0xb68] sm:$0xff]  ;;  %v114_v39 = vld [vmem:[#allocation2 + $0x178] sm:$0xff] }
  0x5c   :  { %591 = vmatpush2.msra.mxu1 %v332_v43  ;;  %521 = vmatprep.subr.mxu0 %v168_v44  ;;  %v428_v40 = vld [vmem:[#allocation2 + $0xb48] sm:$0xff]  ;;  %v110_v41 = vld [vmem:[#allocation2 + $0x158] sm:$0xff]  ;;  %v427_v42 = vld [vmem:[#allocation2 + $0xb40] sm:$0xff] }
  0x5d   :  { %592 = vmatprep.subr.mxu1 %v328_v45  ;;  %522 = vmatpush2.msra.mxu0 %v167_v46  ;;  %v109_v43 = vld [vmem:[#allocation2 + $0x150] sm:$0xff]  ;;  %v423_v44 = vld [vmem:[#allocation2 + $0xb20] sm:$0xff]  ;;  %v422_v46 = vld [vmem:[#allocation2 + $0xb18] sm:$0xff] }
  0x5e   :  { %593 = vmatpush2.msra.mxu1 %v327_v47  ;;  %523 = vmatprep.subr.mxu0 %v163_v48  ;;  %v105_v45 = vld [vmem:[#allocation2 + $0x130] sm:$0xff]  ;;  %v104_v47 = vld [vmem:[#allocation2 + $0x128] sm:$0xff]  ;;  %v418_v48 = vld [vmem:[#allocation2 + $0xaf8] sm:$0xff] }
  0x5f   :  { %594 = vmatprep.subr.mxu1 %v323_v49  ;;  %524 = vmatpush2.msra.mxu0 %v162_v50  ;;  %v100_v49 = vld [vmem:[#allocation2 + $0x108] sm:$0xff]  ;;  %v417_v50 = vld [vmem:[#allocation2 + $0xaf0] sm:$0xff]  ;;  %v403_v60 = vld [vmem:[#allocation2 + $0xa80] sm:$0xff] }
  0x60   :  { %595 = vmatpush2.msra.mxu1 %v322_v51  ;;  %525 = vmatprep.subr.mxu0 %v158_v52  ;;  %v99_v51 = vld [vmem:[#allocation2 + $0x100] sm:$0xff]  ;;  %v413_v52 = vld [vmem:[#allocation2 + $0xad0] sm:$0xff]  ;;  %v402_v62 = vld [vmem:[#allocation2 + $0xa78] sm:$0xff] }
  0x61   :  { %596 = vmatprep.subr.mxu1 %v318_v53  ;;  %526 = vmatpush2.msra.mxu0 %v157_v54  ;;  %v95_v53 = vld [vmem:[#allocation2 + $0xe0] sm:$0xff]  ;;  %v412_v54 = vld [vmem:[#allocation2 + $0xac8] sm:$0xff]  ;;  %v85_v61 = vld [vmem:[#allocation2 + $0x90] sm:$0xff] }
  0x62   :  { %597 = vmatpush2.msra.mxu1 %v317_v55  ;;  %527 = vmatprep.subr.mxu0 %v153_v56  ;;  %v94_v55 = vld [vmem:[#allocation2 + $0xd8] sm:$0xff]  ;;  %v408_v56 = vld [vmem:[#allocation2 + $0xaa8] sm:$0xff]  ;;  %v397_v2 = vld [vmem:[#allocation2 + $0xa50] sm:$0xff] }
  0x63   :  { %598 = vmatprep.subr.mxu1 %v313_v57  ;;  %528 = vmatpush2.msra.mxu0 %v152_v58  ;;  %v90_v57 = vld [vmem:[#allocation2 + $0xb8] sm:$0xff]  ;;  %v407_v58 = vld [vmem:[#allocation2 + $0xaa0] sm:$0xff]  ;;  %v84_v63 = vld [vmem:[#allocation2 + $0x88] sm:$0xff] }
  0x64   :  { %599 = vmatpush2.msra.mxu1 %v312_v59  ;;  %529 = vmatprep.subr.mxu0 %v148_v4  ;;  %v89_v59 = vld [vmem:[#allocation2 + $0xb0] sm:$0xff]  ;;  %v398_v0 = vld [vmem:[#allocation2 + $0xa58] sm:$0xff]  ;;  %v80_v1 = vld [vmem:[#allocation2 + $0x68] sm:$0xff] }
  0x65   :  { %600 = vmatprep.subr.mxu1 %v308_v5  ;;  %530 = vmatpush2.msra.mxu0 %v147_v7  ;;  %v79_v3 = vld [vmem:[#allocation2 + $0x60] sm:$0xff]  ;;  %v393_v4 = vld [vmem:[#allocation2 + $0xa30] sm:$0xff] }
  0x66   :  { %531 = vmatprep.mubr.f32.mxu0 %v1394_v6  ;;  %601 = vmatpush2.msra.mxu1 %v307_v9  ;;  %v75_v5 = vld [vmem:[#allocation2 + $0x40] sm:$0xff]  ;;  %v61_v9 = vld [vmem:[#allocation7 + $0x20] sm:$0xff] }
  0x67   :  { %602 = vmatprep.mubr.f32.mxu1 %v1396_v8  ;;  %532 = vmatmul.mubr.f32.vlgmr.msra.gmra.mxu0 %v1398_v10  ;;  %v56_v7 = vld [vmem:[#allocation5 + $0x20] sm:$0xff] }
  0x68   :  { %603 = vmatmul.mubr.f32.vlgmr.msra.gmra.mxu1 %v1400_v11  ;;  %609 = vmatprep.subr.mxu0 %v463_v12  ;;  %v392_v12 = vld [vmem:[#allocation2 + $0xa28] sm:$0xff] }
  0x69   :  { %680 = vmatprep.subr.mxu1 %v145_v13  ;;  %610 = vmatpush1.msra.mxu0 %v462_v14  ;;  %v74_v13 = vld [vmem:[#allocation2 + $0x38] sm:$0xff]  ;;  %v388_v14 = vld [vmem:[#allocation2 + $0xa08] sm:$0xff] }
  0x6a   :  { %681 = vmatpush1.msra.mxu1 %v144_v15  ;;  %611 = vmatprep.subr.mxu0 %v458_v16  ;;  %v70_v15 = vld [vmem:[#allocation2 + $0x18] sm:$0xff]  ;;  %v387_v16 = vld [vmem:[#allocation2 + $0xa00] sm:$0xff] }
  0x6b   :  { %682 = vmatprep.subr.mxu1 %v140_v17  ;;  %612 = vmatpush1.msra.mxu0 %v457_v18  ;;  %v1406_v17 = vsub.f32 %v56_v7, %v61_v9  ;;  %v69_v18 = vld [vmem:[#allocation2 + $0x10] sm:$0xff]  ;;  %v164_v7 = vld [vmem:[#allocation2 + $0x308] sm:$0xff] }
  0x6c   :  { %683 = vmatpush1.msra.mxu1 %v139_v19  ;;  %613 = vmatprep.subr.mxu0 %v453_v20  ;;  %v225_v19 = vld [vmem:[#allocation2 + $0x4f0] sm:$0xff]  ;;  %v244_v9 = vld [vmem:[#allocation2 + $0x588] sm:$0xff] }
  0x6d   :  { %684 = vmatprep.subr.mxu1 %v135_v21  ;;  %614 = vmatpush1.msra.mxu0 %v452_v22  ;;  %v305_v20 = vld [vmem:[#allocation2 + $0x770] sm:$0xff]  ;;  %v1362_v21 = vmov 0.0   ;;  %v224_v22 = vld [vmem:[#allocation2 + $0x4e8] sm:$0xff] }
  0x6e   :  { %685 = vmatpush1.msra.mxu1 %v134_v23  ;;  %615 = vmatprep.subr.mxu0 %v448_v24  ;;  %v304_v23 = vld [vmem:[#allocation2 + $0x768] sm:$0xff] }
  0x6f   :  { %686 = vmatprep.subr.mxu1 %v130_v25  ;;  %616 = vmatpush1.msra.mxu0 %v447_v26  ;;  %v220_v24 = vld [vmem:[#allocation2 + $0x4c8] sm:$0xff]  ;;  %v219_v26 = vld [vmem:[#allocation2 + $0x4c0] sm:$0xff] }
  0x70   :  { %687 = vmatpush1.msra.mxu1 %v129_v27  ;;  %617 = vmatprep.subr.mxu0 %v443_v28  ;;  %v300_v25 = vld [vmem:[#allocation2 + $0x748] sm:$0xff]  ;;  %v299_v27 = vld [vmem:[#allocation2 + $0x740] sm:$0xff] }
  0x71   :  { %688 = vmatprep.subr.mxu1 %v125_v29  ;;  %618 = vmatpush1.msra.mxu0 %v442_v30  ;;  %v215_v28 = vld [vmem:[#allocation2 + $0x4a0] sm:$0xff]  ;;  %v214_v30 = vld [vmem:[#allocation2 + $0x498] sm:$0xff] }
  0x72   :  { %689 = vmatpush1.msra.mxu1 %v124_v31  ;;  %619 = vmatprep.subr.mxu0 %v438_v32  ;;  %v295_v29 = vld [vmem:[#allocation2 + $0x720] sm:$0xff]  ;;  %v294_v31 = vld [vmem:[#allocation2 + $0x718] sm:$0xff] }
  0x73   :  { %690 = vmatprep.subr.mxu1 %v120_v33  ;;  %620 = vmatpush1.msra.mxu0 %v437_v34  ;;  %v210_v32 = vld [vmem:[#allocation2 + $0x478] sm:$0xff]  ;;  %v209_v34 = vld [vmem:[#allocation2 + $0x470] sm:$0xff] }
  0x74   :  { %691 = vmatpush1.msra.mxu1 %v119_v35  ;;  %621 = vmatprep.subr.mxu0 %v433_v36  ;;  %v290_v33 = vld [vmem:[#allocation2 + $0x6f8] sm:$0xff]  ;;  %v289_v35 = vld [vmem:[#allocation2 + $0x6f0] sm:$0xff] }
  0x75   :  { %692 = vmatprep.subr.mxu1 %v115_v37  ;;  %622 = vmatpush1.msra.mxu0 %v432_v38  ;;  %v205_v36 = vld [vmem:[#allocation2 + $0x450] sm:$0xff]  ;;  %v204_v38 = vld [vmem:[#allocation2 + $0x448] sm:$0xff] }
  0x76   :  { %693 = vmatpush1.msra.mxu1 %v114_v39  ;;  %623 = vmatprep.subr.mxu0 %v428_v40  ;;  %v285_v37 = vld [vmem:[#allocation2 + $0x6d0] sm:$0xff]  ;;  %v284_v39 = vld [vmem:[#allocation2 + $0x6c8] sm:$0xff] }
  0x77   :  { %694 = vmatprep.subr.mxu1 %v110_v41  ;;  %624 = vmatpush1.msra.mxu0 %v427_v42  ;;  %v200_v40 = vld [vmem:[#allocation2 + $0x428] sm:$0xff]  ;;  %v199_v42 = vld [vmem:[#allocation2 + $0x420] sm:$0xff] }
  0x78   :  { %695 = vmatpush1.msra.mxu1 %v109_v43  ;;  %625 = vmatprep.subr.mxu0 %v423_v44  ;;  %v280_v41 = vld [vmem:[#allocation2 + $0x6a8] sm:$0xff]  ;;  %v279_v43 = vld [vmem:[#allocation2 + $0x6a0] sm:$0xff] }
  0x79   :  { %696 = vmatprep.subr.mxu1 %v105_v45  ;;  %626 = vmatpush1.msra.mxu0 %v422_v46  ;;  %v195_v44 = vld [vmem:[#allocation2 + $0x400] sm:$0xff]  ;;  %v194_v46 = vld [vmem:[#allocation2 + $0x3f8] sm:$0xff] }
  0x7a   :  { %697 = vmatpush1.msra.mxu1 %v104_v47  ;;  %627 = vmatprep.subr.mxu0 %v418_v48  ;;  %v275_v45 = vld [vmem:[#allocation2 + $0x680] sm:$0xff]  ;;  %v274_v47 = vld [vmem:[#allocation2 + $0x678] sm:$0xff] }
  0x7b   :  { %698 = vmatprep.subr.mxu1 %v100_v49  ;;  %628 = vmatpush1.msra.mxu0 %v417_v50  ;;  %v190_v48 = vld [vmem:[#allocation2 + $0x3d8] sm:$0xff]  ;;  %v189_v50 = vld [vmem:[#allocation2 + $0x3d0] sm:$0xff] }
  0x7c   :  { %699 = vmatpush1.msra.mxu1 %v99_v51  ;;  %629 = vmatprep.subr.mxu0 %v413_v52  ;;  %v270_v49 = vld [vmem:[#allocation2 + $0x658] sm:$0xff]  ;;  %v269_v51 = vld [vmem:[#allocation2 + $0x650] sm:$0xff] }
  0x7d   :  { %700 = vmatprep.subr.mxu1 %v95_v53  ;;  %630 = vmatpush1.msra.mxu0 %v412_v54  ;;  %v185_v52 = vld [vmem:[#allocation2 + $0x3b0] sm:$0xff]  ;;  %v184_v54 = vld [vmem:[#allocation2 + $0x3a8] sm:$0xff] }
  0x7e   :  { %701 = vmatpush1.msra.mxu1 %v94_v55  ;;  %631 = vmatprep.subr.mxu0 %v408_v56  ;;  %v265_v53 = vld [vmem:[#allocation2 + $0x630] sm:$0xff]  ;;  %v264_v55 = vld [vmem:[#allocation2 + $0x628] sm:$0xff] }
  0x7f   :  { %702 = vmatprep.subr.mxu1 %v90_v57  ;;  %632 = vmatpush1.msra.mxu0 %v407_v58  ;;  %v180_v56 = vld [vmem:[#allocation2 + $0x388] sm:$0xff]  ;;  %v179_v58 = vld [vmem:[#allocation2 + $0x380] sm:$0xff] }
  0x80   :  { %703 = vmatpush1.msra.mxu1 %v89_v59  ;;  %633 = vmatprep.subr.mxu0 %v403_v60  ;;  %v260_v57 = vld [vmem:[#allocation2 + $0x608] sm:$0xff]  ;;  %v259_v59 = vld [vmem:[#allocation2 + $0x600] sm:$0xff] }
  0x81   :  { %704 = vmatprep.subr.mxu1 %v85_v61  ;;  %634 = vmatpush1.msra.mxu0 %v402_v62  ;;  %v175_v60 = vld [vmem:[#allocation2 + $0x360] sm:$0xff]  ;;  %v174_v62 = vld [vmem:[#allocation2 + $0x358] sm:$0xff] }
  0x82   :  { %705 = vmatpush1.msra.mxu1 %v84_v63  ;;  %635 = vmatprep.subr.mxu0 %v398_v0  ;;  %v255_v61 = vld [vmem:[#allocation2 + $0x5e0] sm:$0xff]  ;;  %v254_v63 = vld [vmem:[#allocation2 + $0x5d8] sm:$0xff] }
  0x83   :  { %706 = vmatprep.subr.mxu1 %v80_v1  ;;  %636 = vmatpush1.msra.mxu0 %v397_v2  ;;  %v170_v0 = vld [vmem:[#allocation2 + $0x338] sm:$0xff]  ;;  %v169_v2 = vld [vmem:[#allocation2 + $0x330] sm:$0xff] }
  0x84   :  { %707 = vmatpush1.msra.mxu1 %v79_v3  ;;  %637 = vmatprep.subr.mxu0 %v393_v4  ;;  %v250_v1 = vld [vmem:[#allocation2 + $0x5b8] sm:$0xff]  ;;  %v249_v3 = vld [vmem:[#allocation2 + $0x5b0] sm:$0xff] }
  0x85   :  { %708 = vmatprep.subr.mxu1 %v75_v5  ;;  %638 = vmatpush1.msra.mxu0 %v392_v12  ;;  %v165_v4 = vld [vmem:[#allocation2 + $0x310] sm:$0xff]  ;;  %v160_v12 = vld [vmem:[#allocation2 + $0x2e8] sm:$0xff] }
  0x86   :  { %709 = vmatpush1.msra.mxu1 %v74_v13  ;;  %639 = vmatprep.subr.mxu0 %v388_v14  ;;  %v245_v5 = vld [vmem:[#allocation2 + $0x590] sm:$0xff]  ;;  %v240_v13 = vld [vmem:[#allocation2 + $0x568] sm:$0xff]  ;;  %v159_v14 = vld [vmem:[#allocation2 + $0x2e0] sm:$0xff] }
  0x87   :  { %710 = vmatprep.subr.mxu1 %v70_v15  ;;  %640 = vmatpush1.msra.mxu0 %v387_v16  ;;  %v239_v15 = vld [vmem:[#allocation2 + $0x560] sm:$0xff] }
  0x88   :  { %673 = vmatprep.mubr.f32.mxu0 %v1362_v21  ;;  %711 = vmatpush1.msra.mxu1 %v69_v18  ;;  %v155_v16 = vld [vmem:[#allocation2 + $0x2c0] sm:$0xff] }
  0x89   :  { %674 = vmatmul.mubr.f32.vlgmr.msra.gmra.mxu0 %v1406_v17  ;;  %712 = vmatprep.subr.mxu1 %v225_v19  ;;  %v235_v18 = vld [vmem:[#allocation2 + $0x540] sm:$0xff]  ;;  %v154_v19 = vld [vmem:[#allocation2 + $0x2b8] sm:$0xff] }
  0x8a   :  { %751 = vmatprep.subr.mxu0 %v305_v20  ;;  %713 = vmatpush2.msra.mxu1 %v224_v22  ;;  %v234_v20 = vld [vmem:[#allocation2 + $0x538] sm:$0xff] }
  0x8b   :  { %752 = vmatpush1.msra.mxu0 %v304_v23  ;;  %714 = vmatprep.subr.mxu1 %v220_v24  ;;  %v150_v22 = vld [vmem:[#allocation2 + $0x298] sm:$0xff]  ;;  %v149_v24 = vld [vmem:[#allocation2 + $0x290] sm:$0xff] }
  0x8c   :  { %753 = vmatprep.subr.mxu0 %v300_v25  ;;  %715 = vmatpush2.msra.mxu1 %v219_v26  ;;  %v230_v23 = vld [vmem:[#allocation2 + $0x518] sm:$0xff]  ;;  %v229_v25 = vld [vmem:[#allocation2 + $0x510] sm:$0xff] }
  0x8d   :  { %754 = vmatpush1.msra.mxu0 %v299_v27  ;;  %716 = vmatprep.subr.mxu1 %v215_v28  ;;  %v385_v26 = vld [vmem:[#allocation2 + $0x9f0] sm:$0xff]  ;;  %v384_v28 = vld [vmem:[#allocation2 + $0x9e8] sm:$0xff] }
  0x8e   :  { %755 = vmatprep.subr.mxu0 %v295_v29  ;;  %717 = vmatpush2.msra.mxu1 %v214_v30  ;;  %v465_v27 = vld [vmem:[#allocation2 + $0xc70] sm:$0xff]  ;;  %v464_v29 = vld [vmem:[#allocation2 + $0xc68] sm:$0xff] }
  0x8f   :  { %756 = vmatpush1.msra.mxu0 %v294_v31  ;;  %718 = vmatprep.subr.mxu1 %v210_v32  ;;  %v380_v30 = vld [vmem:[#allocation2 + $0x9c8] sm:$0xff]  ;;  %v379_v32 = vld [vmem:[#allocation2 + $0x9c0] sm:$0xff] }
  0x90   :  { %757 = vmatprep.subr.mxu0 %v290_v33  ;;  %719 = vmatpush2.msra.mxu1 %v209_v34  ;;  %v460_v31 = vld [vmem:[#allocation2 + $0xc48] sm:$0xff]  ;;  %v459_v33 = vld [vmem:[#allocation2 + $0xc40] sm:$0xff] }
  0x91   :  { %758 = vmatpush1.msra.mxu0 %v289_v35  ;;  %720 = vmatprep.subr.mxu1 %v205_v36  ;;  %v375_v34 = vld [vmem:[#allocation2 + $0x9a0] sm:$0xff]  ;;  %v374_v36 = vld [vmem:[#allocation2 + $0x998] sm:$0xff] }
  0x92   :  { %759 = vmatprep.subr.mxu0 %v285_v37  ;;  %721 = vmatpush2.msra.mxu1 %v204_v38  ;;  %v455_v35 = vld [vmem:[#allocation2 + $0xc20] sm:$0xff]  ;;  %v454_v37 = vld [vmem:[#allocation2 + $0xc18] sm:$0xff] }
  0x93   :  { %760 = vmatpush1.msra.mxu0 %v284_v39  ;;  %722 = vmatprep.subr.mxu1 %v200_v40  ;;  %v370_v38 = vld [vmem:[#allocation2 + $0x978] sm:$0xff]  ;;  %v369_v40 = vld [vmem:[#allocation2 + $0x970] sm:$0xff] }
  0x94   :  { %761 = vmatprep.subr.mxu0 %v280_v41  ;;  %723 = vmatpush2.msra.mxu1 %v199_v42  ;;  %v450_v39 = vld [vmem:[#allocation2 + $0xbf8] sm:$0xff]  ;;  %v449_v41 = vld [vmem:[#allocation2 + $0xbf0] sm:$0xff] }
  0x95   :  { %762 = vmatpush1.msra.mxu0 %v279_v43  ;;  %724 = vmatprep.subr.mxu1 %v195_v44  ;;  %v365_v42 = vld [vmem:[#allocation2 + $0x950] sm:$0xff]  ;;  %v364_v44 = vld [vmem:[#allocation2 + $0x948] sm:$0xff] }
  0x96   :  { %763 = vmatprep.subr.mxu0 %v275_v45  ;;  %725 = vmatpush2.msra.mxu1 %v194_v46  ;;  %v445_v43 = vld [vmem:[#allocation2 + $0xbd0] sm:$0xff]  ;;  %v444_v45 = vld [vmem:[#allocation2 + $0xbc8] sm:$0xff] }
  0x97   :  { %764 = vmatpush1.msra.mxu0 %v274_v47  ;;  %726 = vmatprep.subr.mxu1 %v190_v48  ;;  %v360_v46 = vld [vmem:[#allocation2 + $0x928] sm:$0xff]  ;;  %v359_v48 = vld [vmem:[#allocation2 + $0x920] sm:$0xff] }
  0x98   :  { %765 = vmatprep.subr.mxu0 %v270_v49  ;;  %727 = vmatpush2.msra.mxu1 %v189_v50  ;;  %v440_v47 = vld [vmem:[#allocation2 + $0xba8] sm:$0xff]  ;;  %v439_v49 = vld [vmem:[#allocation2 + $0xba0] sm:$0xff] }
  0x99   :  { %766 = vmatpush1.msra.mxu0 %v269_v51  ;;  %728 = vmatprep.subr.mxu1 %v185_v52  ;;  %v355_v50 = vld [vmem:[#allocation2 + $0x900] sm:$0xff]  ;;  %v354_v52 = vld [vmem:[#allocation2 + $0x8f8] sm:$0xff] }
  0x9a   :  { %767 = vmatprep.subr.mxu0 %v265_v53  ;;  %729 = vmatpush2.msra.mxu1 %v184_v54  ;;  %v435_v51 = vld [vmem:[#allocation2 + $0xb80] sm:$0xff]  ;;  %v434_v53 = vld [vmem:[#allocation2 + $0xb78] sm:$0xff] }
  0x9b   :  { %768 = vmatpush1.msra.mxu0 %v264_v55  ;;  %730 = vmatprep.subr.mxu1 %v180_v56  ;;  %v350_v54 = vld [vmem:[#allocation2 + $0x8d8] sm:$0xff]  ;;  %v349_v56 = vld [vmem:[#allocation2 + $0x8d0] sm:$0xff] }
  0x9c   :  { %769 = vmatprep.subr.mxu0 %v260_v57  ;;  %731 = vmatpush2.msra.mxu1 %v179_v58  ;;  %v430_v55 = vld [vmem:[#allocation2 + $0xb58] sm:$0xff]  ;;  %v429_v57 = vld [vmem:[#allocation2 + $0xb50] sm:$0xff] }
  0x9d   :  { %770 = vmatpush1.msra.mxu0 %v259_v59  ;;  %732 = vmatprep.subr.mxu1 %v175_v60  ;;  %v345_v58 = vld [vmem:[#allocation2 + $0x8b0] sm:$0xff]  ;;  %v344_v60 = vld [vmem:[#allocation2 + $0x8a8] sm:$0xff] }
  0x9e   :  { %771 = vmatprep.subr.mxu0 %v255_v61  ;;  %733 = vmatpush2.msra.mxu1 %v174_v62  ;;  %v425_v59 = vld [vmem:[#allocation2 + $0xb30] sm:$0xff]  ;;  %v424_v61 = vld [vmem:[#allocation2 + $0xb28] sm:$0xff] }
  0x9f   :  { %772 = vmatpush1.msra.mxu0 %v254_v63  ;;  %734 = vmatprep.subr.mxu1 %v170_v0  ;;  %v340_v62 = vld [vmem:[#allocation2 + $0x888] sm:$0xff]  ;;  %v339_v0 = vld [vmem:[#allocation2 + $0x880] sm:$0xff] }
  0xa0   :  { %773 = vmatprep.subr.mxu0 %v250_v1  ;;  %735 = vmatpush2.msra.mxu1 %v169_v2  ;;  %v420_v63 = vld [vmem:[#allocation2 + $0xb08] sm:$0xff]  ;;  %v419_v1 = vld [vmem:[#allocation2 + $0xb00] sm:$0xff] }
  0xa1   :  { %774 = vmatpush1.msra.mxu0 %v249_v3  ;;  %736 = vmatprep.subr.mxu1 %v165_v4  ;;  %v335_v2 = vld [vmem:[#allocation2 + $0x860] sm:$0xff]  ;;  %v334_v4 = vld [vmem:[#allocation2 + $0x858] sm:$0xff] }
  0xa2   :  { %775 = vmatprep.subr.mxu0 %v245_v5  ;;  %737 = vmatpush2.msra.mxu1 %v164_v7  ;;  %v415_v3 = vld [vmem:[#allocation2 + $0xae0] sm:$0xff]  ;;  %v414_v5 = vld [vmem:[#allocation2 + $0xad8] sm:$0xff] }
  0xa3   :  { %776 = vmatpush1.msra.mxu0 %v244_v9  ;;  %738 = vmatprep.subr.mxu1 %v160_v12  ;;  %v330_v7 = vld [vmem:[#allocation2 + $0x838] sm:$0xff]  ;;  %v329_v12 = vld [vmem:[#allocation2 + $0x830] sm:$0xff] }
  0xa4   :  { %777 = vmatprep.subr.mxu0 %v240_v13  ;;  %739 = vmatpush2.msra.mxu1 %v159_v14  ;;  %v410_v9 = vld [vmem:[#allocation2 + $0xab8] sm:$0xff]  ;;  %v409_v13 = vld [vmem:[#allocation2 + $0xab0] sm:$0xff] }
  0xa5   :  { %778 = vmatpush1.msra.mxu0 %v239_v15  ;;  %740 = vmatprep.subr.mxu1 %v155_v16  ;;  %v325_v14 = vld [vmem:[#allocation2 + $0x810] sm:$0xff]  ;;  %v324_v16 = vld [vmem:[#allocation2 + $0x808] sm:$0xff] }
  0xa6   :  { %779 = vmatprep.subr.mxu0 %v235_v18  ;;  %741 = vmatpush2.msra.mxu1 %v154_v19  ;;  %v405_v15 = vld [vmem:[#allocation2 + $0xa90] sm:$0xff]  ;;  %v404_v18 = vld [vmem:[#allocation2 + $0xa88] sm:$0xff] }
  0xa7   :  { %780 = vmatpush1.msra.mxu0 %v234_v20  ;;  %742 = vmatprep.subr.mxu1 %v150_v22  ;;  %v320_v19 = vld [vmem:[#allocation2 + $0x7e8] sm:$0xff]  ;;  %v319_v22 = vld [vmem:[#allocation2 + $0x7e0] sm:$0xff] }
  0xa8   :  { %781 = vmatprep.subr.mxu0 %v230_v23  ;;  %743 = vmatpush2.msra.mxu1 %v149_v24  ;;  %v400_v20 = vld [vmem:[#allocation2 + $0xa68] sm:$0xff]  ;;  %v399_v23 = vld [vmem:[#allocation2 + $0xa60] sm:$0xff] }
  0xa9   :  { %782 = vmatpush1.msra.mxu0 %v229_v25  ;;  %744 = vmatprep.mubr.f32.mxu1 %v1394_v6  ;;  %v315_v24 = vld [vmem:[#allocation2 + $0x7c0] sm:$0xff] }
  0xaa   :  { %783 = vmatprep.subr.mxu0 %v385_v26  ;;  %822 = vmatprep.subr.mxu1 %v465_v27  ;;  %v395_v25 = vld [vmem:[#allocation2 + $0xa40] sm:$0xff]  ;;  %v314_v26 = vld [vmem:[#allocation2 + $0x7b8] sm:$0xff] }
  0xab   :  { %745 = vmatmul.mubr.f32.vlgmr.msra.gmra.mxu1 %v1398_v10  ;;  %784 = vmatpush2.msra.mxu0 %v384_v28  ;;  %v394_v27 = vld [vmem:[#allocation2 + $0xa38] sm:$0xff] }
  0xac   :  { %823 = vmatpush1.msra.mxu1 %v464_v29  ;;  %785 = vmatprep.subr.mxu0 %v380_v30  ;;  %v310_v28 = vld [vmem:[#allocation2 + $0x798] sm:$0xff]  ;;  %v309_v30 = vld [vmem:[#allocation2 + $0x790] sm:$0xff] }
  0xad   :  { %824 = vmatprep.subr.mxu1 %v460_v31  ;;  %786 = vmatpush2.msra.mxu0 %v379_v32  ;;  %v390_v29 = vld [vmem:[#allocation2 + $0xa18] sm:$0xff]  ;;  %v389_v31 = vld [vmem:[#allocation2 + $0xa10] sm:$0xff] }
  0xae   :  { %825 = vmatpush1.msra.mxu1 %v459_v33  ;;  %787 = vmatprep.subr.mxu0 %v375_v34  ;;  %v226_v32 = vld [vmem:[#allocation2 + $0x4f8] sm:$0xff] }
  0xaf   :  { %826 = vmatprep.subr.mxu1 %v455_v35  ;;  %788 = vmatpush2.msra.mxu0 %v374_v36  ;;  %v386_v33 = vld [vmem:[#allocation2 + $0x9f8] sm:$0xff]  ;;  %v221_v36 = vld [vmem:[#allocation2 + $0x4d0] sm:$0xff] }
  0xb0   :  { %827 = vmatpush1.msra.mxu1 %v454_v37  ;;  %789 = vmatprep.subr.mxu0 %v370_v38  ;;  %v146_v34 = vld [vmem:[#allocation2 + $0x278] sm:$0xff]  ;;  %v381_v37 = vld [vmem:[#allocation2 + $0x9d0] sm:$0xff] }
  0xb1   :  { %828 = vmatprep.subr.mxu1 %v450_v39  ;;  %790 = vmatpush2.msra.mxu0 %v369_v40  ;;  %v306_v35 = vld [vmem:[#allocation2 + $0x778] sm:$0xff]  ;;  %v141_v38 = vld [vmem:[#allocation2 + $0x250] sm:$0xff]  ;;  %v216_v40 = vld [vmem:[#allocation2 + $0x4a8] sm:$0xff] }
  0xb2   :  { %829 = vmatpush1.msra.mxu1 %v449_v41  ;;  %791 = vmatprep.subr.mxu0 %v365_v42  ;;  %v301_v39 = vld [vmem:[#allocation2 + $0x750] sm:$0xff]  ;;  %v376_v41 = vld [vmem:[#allocation2 + $0x9a8] sm:$0xff] }
  0xb3   :  { %830 = vmatprep.subr.mxu1 %v445_v43  ;;  %792 = vmatpush2.msra.mxu0 %v364_v44  ;;  %v136_v42 = vld [vmem:[#allocation2 + $0x228] sm:$0xff]  ;;  %v211_v44 = vld [vmem:[#allocation2 + $0x480] sm:$0xff] }
  0xb4   :  { %831 = vmatpush1.msra.mxu1 %v444_v45  ;;  %793 = vmatprep.subr.mxu0 %v360_v46  ;;  %v296_v43 = vld [vmem:[#allocation2 + $0x728] sm:$0xff]  ;;  %v371_v45 = vld [vmem:[#allocation2 + $0x980] sm:$0xff] }
  0xb5   :  { %832 = vmatprep.subr.mxu1 %v440_v47  ;;  %794 = vmatpush2.msra.mxu0 %v359_v48  ;;  %v131_v46 = vld [vmem:[#allocation2 + $0x200] sm:$0xff]  ;;  %v206_v48 = vld [vmem:[#allocation2 + $0x458] sm:$0xff] }
  0xb6   :  { %833 = vmatpush1.msra.mxu1 %v439_v49  ;;  %795 = vmatprep.subr.mxu0 %v355_v50  ;;  %v291_v47 = vld [vmem:[#allocation2 + $0x700] sm:$0xff]  ;;  %v366_v49 = vld [vmem:[#allocation2 + $0x958] sm:$0xff] }
  0xb7   :  { %834 = vmatprep.subr.mxu1 %v435_v51  ;;  %796 = vmatpush2.msra.mxu0 %v354_v52  ;;  %v126_v50 = vld [vmem:[#allocation2 + $0x1d8] sm:$0xff]  ;;  %v201_v52 = vld [vmem:[#allocation2 + $0x430] sm:$0xff] }
  0xb8   :  { %835 = vmatpush1.msra.mxu1 %v434_v53  ;;  %797 = vmatprep.subr.mxu0 %v350_v54  ;;  %v286_v51 = vld [vmem:[#allocation2 + $0x6d8] sm:$0xff]  ;;  %v361_v53 = vld [vmem:[#allocation2 + $0x930] sm:$0xff] }
  0xb9   :  { %836 = vmatprep.subr.mxu1 %v430_v55  ;;  %798 = vmatpush2.msra.mxu0 %v349_v56  ;;  %v121_v54 = vld [vmem:[#allocation2 + $0x1b0] sm:$0xff]  ;;  %v196_v56 = vld [vmem:[#allocation2 + $0x408] sm:$0xff] }
  0xba   :  { %837 = vmatpush1.msra.mxu1 %v429_v57  ;;  %799 = vmatprep.subr.mxu0 %v345_v58  ;;  %v281_v55 = vld [vmem:[#allocation2 + $0x6b0] sm:$0xff]  ;;  %v356_v57 = vld [vmem:[#allocation2 + $0x908] sm:$0xff] }
  0xbb   :  { %838 = vmatprep.subr.mxu1 %v425_v59  ;;  %800 = vmatpush2.msra.mxu0 %v344_v60  ;;  %v116_v58 = vld [vmem:[#allocation2 + $0x188] sm:$0xff]  ;;  %v191_v60 = vld [vmem:[#allocation2 + $0x3e0] sm:$0xff] }
  0xbc   :  { %839 = vmatpush1.msra.mxu1 %v424_v61  ;;  %801 = vmatprep.subr.mxu0 %v340_v62  ;;  %v276_v59 = vld [vmem:[#allocation2 + $0x688] sm:$0xff]  ;;  %v351_v61 = vld [vmem:[#allocation2 + $0x8e0] sm:$0xff] }
  0xbd   :  { %840 = vmatprep.subr.mxu1 %v420_v63  ;;  %802 = vmatpush2.msra.mxu0 %v339_v0  ;;  %v111_v62 = vld [vmem:[#allocation2 + $0x160] sm:$0xff]  ;;  %v186_v0 = vld [vmem:[#allocation2 + $0x3b8] sm:$0xff] }
  0xbe   :  { %841 = vmatpush1.msra.mxu1 %v419_v1  ;;  %803 = vmatprep.subr.mxu0 %v335_v2  ;;  %v271_v63 = vld [vmem:[#allocation2 + $0x660] sm:$0xff]  ;;  %v346_v1 = vld [vmem:[#allocation2 + $0x8b8] sm:$0xff] }
  0xbf   :  { %842 = vmatprep.subr.mxu1 %v415_v3  ;;  %804 = vmatpush2.msra.mxu0 %v334_v4  ;;  %v106_v2 = vld [vmem:[#allocation2 + $0x138] sm:$0xff]  ;;  %v181_v4 = vld [vmem:[#allocation2 + $0x390] sm:$0xff] }
  0xc0   :  { %843 = vmatpush1.msra.mxu1 %v414_v5  ;;  %805 = vmatprep.subr.mxu0 %v330_v7  ;;  %v266_v3 = vld [vmem:[#allocation2 + $0x638] sm:$0xff]  ;;  %v341_v5 = vld [vmem:[#allocation2 + $0x890] sm:$0xff] }
  0xc1   :  { %844 = vmatprep.subr.mxu1 %v410_v9  ;;  %806 = vmatpush2.msra.mxu0 %v329_v12  ;;  %v101_v7 = vld [vmem:[#allocation2 + $0x110] sm:$0xff]  ;;  %v176_v12 = vld [vmem:[#allocation2 + $0x368] sm:$0xff] }
  0xc2   :  { %845 = vmatpush1.msra.mxu1 %v409_v13  ;;  %807 = vmatprep.subr.mxu0 %v325_v14  ;;  %v261_v9 = vld [vmem:[#allocation2 + $0x610] sm:$0xff]  ;;  %v336_v13 = vld [vmem:[#allocation2 + $0x868] sm:$0xff] }
  0xc3   :  { %846 = vmatprep.subr.mxu1 %v405_v15  ;;  %808 = vmatpush2.msra.mxu0 %v324_v16  ;;  %v96_v14 = vld [vmem:[#allocation2 + $0xe8] sm:$0xff]  ;;  %v171_v16 = vld [vmem:[#allocation2 + $0x340] sm:$0xff] }
  0xc4   :  { %847 = vmatpush1.msra.mxu1 %v404_v18  ;;  %809 = vmatprep.subr.mxu0 %v320_v19  ;;  %v256_v15 = vld [vmem:[#allocation2 + $0x5e8] sm:$0xff]  ;;  %v331_v18 = vld [vmem:[#allocation2 + $0x840] sm:$0xff] }
  0xc5   :  { %848 = vmatprep.subr.mxu1 %v400_v20  ;;  %810 = vmatpush2.msra.mxu0 %v319_v22  ;;  %v91_v19 = vld [vmem:[#allocation2 + $0xc0] sm:$0xff]  ;;  %v166_v22 = vld [vmem:[#allocation2 + $0x318] sm:$0xff] }
  0xc6   :  { %849 = vmatpush1.msra.mxu1 %v399_v23  ;;  %811 = vmatprep.subr.mxu0 %v315_v24  ;;  %v251_v20 = vld [vmem:[#allocation2 + $0x5c0] sm:$0xff]  ;;  %v326_v23 = vld [vmem:[#allocation2 + $0x818] sm:$0xff] }
  0xc7   :  { %850 = vmatprep.subr.mxu1 %v395_v25  ;;  %812 = vmatpush2.msra.mxu0 %v314_v26  ;;  %v86_v24 = vld [vmem:[#allocation2 + $0x98] sm:$0xff]  ;;  %v161_v26 = vld [vmem:[#allocation2 + $0x2f0] sm:$0xff] }
  0xc8   :  { %851 = vmatpush1.msra.mxu1 %v394_v27  ;;  %813 = vmatprep.subr.mxu0 %v310_v28  ;;  %v246_v25 = vld [vmem:[#allocation2 + $0x598] sm:$0xff]  ;;  %v321_v27 = vld [vmem:[#allocation2 + $0x7f0] sm:$0xff] }
  0xc9   :  { %852 = vmatprep.subr.mxu1 %v390_v29  ;;  %814 = vmatpush2.msra.mxu0 %v309_v30  ;;  %v81_v28 = vld [vmem:[#allocation2 + $0x70] sm:$0xff]  ;;  %v156_v30 = vld [vmem:[#allocation2 + $0x2c8] sm:$0xff] }
  0xca   :  { %815 = vmatprep.mubr.f32.mxu0 %v1396_v8  ;;  %853 = vmatpush1.msra.mxu1 %v389_v31  ;;  %v241_v29 = vld [vmem:[#allocation2 + $0x570] sm:$0xff]  ;;  %v316_v31 = vld [vmem:[#allocation2 + $0x7c8] sm:$0xff] }
  0xcb   :  { %816 = vmatmul.mubr.f32.vlgmr.msra.gmra.mxu0 %v1400_v11  ;;  %886 = vmatprep.mubr.f32.mxu1 %v1362_v21 }
  0xcc   :  { %1139 = vmatprep.subr.mxu0 %v226_v32  ;;  %1174 = vmatprep.subr.mxu1 %v386_v33  ;;  %v76_v32 = vld [vmem:[#allocation2 + $0x48] sm:$0xff] }
  0xcd   :  { %887 = vmatmul.mubr.f32.vlgmr.msra.gmra.mxu1 %v1406_v17  ;;  %1140 = vmatpush3.msra.mxu0 %v146_v34  ;;  %v236_v33 = vld [vmem:[#allocation2 + $0x548] sm:$0xff]  ;;  %v151_v34 = vld [vmem:[#allocation2 + $0x2a0] sm:$0xff] }
  0xce   :  { %1175 = vmatpush3.msra.mxu1 %v306_v35  ;;  %1141 = vmatprep.subr.mxu0 %v221_v36  ;;  %v311_v35 = vld [vmem:[#allocation2 + $0x7a0] sm:$0xff] }
  0xcf   :  { %1176 = vmatprep.subr.mxu1 %v381_v37  ;;  %1142 = vmatpush3.msra.mxu0 %v141_v38  ;;  %v71_v36 = vld [vmem:[#allocation2 + $0x20] sm:$0xff]  ;;  %v466_v38 = vld [vmem:[#allocation2 + $0xc78] sm:$0xff] }
  0xd0   :  { %1177 = vmatpush3.msra.mxu1 %v301_v39  ;;  %1143 = vmatprep.subr.mxu0 %v216_v40  ;;  %v231_v37 = vld [vmem:[#allocation2 + $0x520] sm:$0xff]  ;;  %v461_v39 = vld [vmem:[#allocation2 + $0xc50] sm:$0xff]  ;;  %v456_v40 = vld [vmem:[#allocation2 + $0xc28] sm:$0xff] }
  0xd1   :  { %1178 = vmatprep.subr.mxu1 %v376_v41  ;;  %1144 = vmatpush3.msra.mxu0 %v136_v42  ;;  %v431_v41 = vld [vmem:[#allocation2 + $0xb60] sm:$0xff]  ;;  %v426_v42 = vld [vmem:[#allocation2 + $0xb38] sm:$0xff] }
  0xd2   :  { %1179 = vmatpush3.msra.mxu1 %v296_v43  ;;  %1145 = vmatprep.subr.mxu0 %v211_v44  ;;  %v421_v43 = vld [vmem:[#allocation2 + $0xb10] sm:$0xff]  ;;  %v416_v44 = vld [vmem:[#allocation2 + $0xae8] sm:$0xff] }
  0xd3   :  { %1180 = vmatprep.subr.mxu1 %v371_v45  ;;  %1146 = vmatpush3.msra.mxu0 %v131_v46  ;;  %v411_v45 = vld [vmem:[#allocation2 + $0xac0] sm:$0xff]  ;;  %v406_v46 = vld [vmem:[#allocation2 + $0xa98] sm:$0xff] }
  0xd4   :  { %1181 = vmatpush3.msra.mxu1 %v291_v47  ;;  %1147 = vmatprep.subr.mxu0 %v206_v48  ;;  %v401_v47 = vld [vmem:[#allocation2 + $0xa70] sm:$0xff]  ;;  %v396_v48 = vld [vmem:[#allocation2 + $0xa48] sm:$0xff] }
  0xd5   :  { %1182 = vmatprep.subr.mxu1 %v366_v49  ;;  %1148 = vmatpush3.msra.mxu0 %v126_v50  ;;  %v391_v49 = vld [vmem:[#allocation2 + $0xa20] sm:$0xff] }
  0xd6   :  { %1183 = vmatpush3.msra.mxu1 %v286_v51  ;;  %1149 = vmatprep.subr.mxu0 %v201_v52 }
  0xd7   :  { %1184 = vmatprep.subr.mxu1 %v361_v53  ;;  %1150 = vmatpush3.msra.mxu0 %v121_v54 }
  0xd8   :  { %1185 = vmatpush3.msra.mxu1 %v281_v55  ;;  %1151 = vmatprep.subr.mxu0 %v196_v56 }
  0xd9   :  { %1186 = vmatprep.subr.mxu1 %v356_v57  ;;  %1152 = vmatpush3.msra.mxu0 %v116_v58 }
  0xda   :  { %1187 = vmatpush3.msra.mxu1 %v276_v59  ;;  %1153 = vmatprep.subr.mxu0 %v191_v60 }
  0xdb   :  { %1188 = vmatprep.subr.mxu1 %v351_v61  ;;  %1154 = vmatpush3.msra.mxu0 %v111_v62 }
  0xdc   :  { %1189 = vmatpush3.msra.mxu1 %v271_v63  ;;  %1155 = vmatprep.subr.mxu0 %v186_v0 }
  0xdd   :  { %1190 = vmatprep.subr.mxu1 %v346_v1  ;;  %1156 = vmatpush3.msra.mxu0 %v106_v2 }
  0xde   :  { %1191 = vmatpush3.msra.mxu1 %v266_v3  ;;  %1157 = vmatprep.subr.mxu0 %v181_v4 }
  0xdf   :  { %1192 = vmatprep.subr.mxu1 %v341_v5  ;;  %1158 = vmatpush3.msra.mxu0 %v101_v7 }
  0xe0   :  { %1193 = vmatpush3.msra.mxu1 %v261_v9  ;;  %1159 = vmatprep.subr.mxu0 %v176_v12 }
  0xe1   :  { %1194 = vmatprep.subr.mxu1 %v336_v13  ;;  %1160 = vmatpush3.msra.mxu0 %v96_v14 }
  0xe2   :  { %1195 = vmatpush3.msra.mxu1 %v256_v15  ;;  %1161 = vmatprep.subr.mxu0 %v171_v16 }
  0xe3   :  { %1196 = vmatprep.subr.mxu1 %v331_v18  ;;  %1162 = vmatpush3.msra.mxu0 %v91_v19 }
  0xe4   :  { %1197 = vmatpush3.msra.mxu1 %v251_v20  ;;  %1163 = vmatprep.subr.mxu0 %v166_v22 }
  0xe5   :  { %1198 = vmatprep.subr.mxu1 %v326_v23  ;;  %1164 = vmatpush3.msra.mxu0 %v86_v24 }
  0xe6   :  { %1199 = vmatpush3.msra.mxu1 %v246_v25  ;;  %1165 = vmatprep.subr.mxu0 %v161_v26 }
  0xe7   :  { %1200 = vmatprep.subr.mxu1 %v321_v27  ;;  %1166 = vmatpush3.msra.mxu0 %v81_v28 }
  0xe8   :  { %1201 = vmatpush3.msra.mxu1 %v241_v29  ;;  %1167 = vmatprep.subr.mxu0 %v156_v30 }
  0xe9   :  { %1202 = vmatprep.subr.mxu1 %v316_v31  ;;  %1168 = vmatpush3.msra.mxu0 %v76_v32 }
  0xea   :  { %1203 = vmatpush3.msra.mxu1 %v236_v33  ;;  %1169 = vmatprep.subr.mxu0 %v151_v34 }
  0xeb   :  { %1204 = vmatprep.subr.mxu1 %v311_v35  ;;  %1170 = vmatpush3.msra.mxu0 %v71_v36 }
  0xec   :  { %957 = vmatprep.mubr.f32.mxu0 %v1394_v6  ;;  %1205 = vmatpush3.msra.mxu1 %v231_v37  ;;  %v451_v6 = vld [vmem:[#allocation2 + $0xc00] sm:$0xff] }
  0xed   :  { %1027 = vmatprep.mubr.f32.mxu1 %v1396_v8  ;;  %958 = vmatmul.mubr.f32.vlgmr.msra.gmra.mxu0 %v1398_v10  ;;  %v446_v8 = vld [vmem:[#allocation2 + $0xbd8] sm:$0xff]  ;;  %v441_v10 = vld [vmem:[#allocation2 + $0xbb0] sm:$0xff] }
  0xee   :  { %1028 = vmatmul.mubr.f32.vlgmr.msra.gmra.mxu1 %v1400_v11  ;;  %1226 = vmatprep.subr.mxu0 %v1362_v21  ;;  %v436_v11 = vld [vmem:[#allocation2 + $0xb88] sm:$0xff] }
  0xef   :  { %1258 = vmatprep.mubr.msk.f32.mxu0 %vm1363_vm0, %v1362_v21  ;;  %1227 = vmatpush3.msra.mxu0 %v466_v38 }
  0xf0   :  { %1228 = vmatprep.subr.mxu0 %v1362_v21 }
  0xf1   :  { %1229 = vmatpush3.msra.mxu0 %v461_v39 }
  0xf2   :  { %1230 = vmatprep.subr.mxu0 %v1362_v21 }
  0xf3   :  { %1231 = vmatpush3.msra.mxu0 %v456_v40 }
  0xf4   :  { %1232 = vmatprep.subr.mxu0 %v1362_v21 }
  0xf5   :  { %1233 = vmatpush3.msra.mxu0 %v451_v6 }
  0xf6   :  { %1234 = vmatprep.subr.mxu0 %v1362_v21 }
  0xf7   :  { %1235 = vmatpush3.msra.mxu0 %v446_v8 }
  0xf8   :  { %1236 = vmatprep.subr.mxu0 %v1362_v21 }
  0xf9   :  { %1237 = vmatpush3.msra.mxu0 %v441_v10 }
  0xfa   :  { %1238 = vmatprep.subr.mxu0 %v1362_v21 }
  0xfb   :  { %1239 = vmatpush3.msra.mxu0 %v436_v11 }
  0xfc   :  { %1240 = vmatprep.subr.mxu0 %v1362_v21 }
  0xfd   :  { %1241 = vmatpush3.msra.mxu0 %v431_v41 }
  0xfe   :  { %1242 = vmatprep.subr.mxu0 %v1362_v21 }
  0xff   :  { %1243 = vmatpush3.msra.mxu0 %v426_v42 }
 0x100   :  { %1244 = vmatprep.subr.mxu0 %v1362_v21 }
 0x101   :  { %1245 = vmatpush3.msra.mxu0 %v421_v43 }
 0x102   :  { %1246 = vmatprep.subr.mxu0 %v1362_v21 }
 0x103   :  { %1247 = vmatpush3.msra.mxu0 %v416_v44 }
 0x104   :  { %1248 = vmatprep.subr.mxu0 %v1362_v21 }
 0x105   :  { %1249 = vmatpush3.msra.mxu0 %v411_v45 }
 0x106   :  { %1250 = vmatprep.subr.mxu0 %v1362_v21 }
 0x107   :  { %1251 = vmatpush3.msra.mxu0 %v406_v46 }
 0x108   :  { %1252 = vmatprep.subr.mxu0 %v1362_v21 }
 0x109   :  { %1253 = vmatpush3.msra.mxu0 %v401_v47 }
 0x10a   :  { %1254 = vmatprep.subr.mxu0 %v1362_v21 }
 0x10b   :  { %1255 = vmatpush3.msra.mxu0 %v396_v48 }
 0x10c   :  { %1256 = vmatprep.subr.mxu0 %v1362_v21 }
 0x10d   :  { %1257 = vmatpush3.msra.mxu0 %v391_v49 }
 0x10e   :  { %1259 = vmatmul.mubr.f32.vlgmr.msra.gmra.mxu0 %v1406_v17 }
 0x127   :  { %v533_v50 = vpop.f32.mrf.mxu0 }
 0x128   :  { %v604_v51 = vpop.f32.mrf.mxu1 }
 0x129   :  { %v535_v52 = vpop.f32.mrf.mxu0  ;;  %v605_v0 = vadd.f32 %v604_v51, %v533_v50 }
 0x12a   :  { %v606_v53 = vpop.f32.mrf.mxu1 }
 0x12b   :  { %v607_v62 = vadd.f32 %v606_v53, %v535_v52 }
 0x149   :  { %v675_v54 = vpop.f32.mrf.mxu0 }
 0x14a   :  { %v676_v3 = vadd.f32 %v675_v54, %v605_v0 }
 0x14b   :  { %v677_v56 = vpop.f32.mrf.mxu0 }
 0x14c   :  { %v678_v2 = vadd.f32 %v677_v56, %v607_v62  ;;  %v1103_v12 = vand.u32 2147483647, %v676_v3 }
 0x14e   :  { %v1104_v9 = vand.u32 2147483647, %v678_v2 }
 0x150   :  { %v1108_v18 = vadd.f32 %v1104_v9, %v1103_v12 }
 0x16b   :  { %v746_v55 = vpop.f32.mrf.mxu1 }
 0x16d   :  { %v748_v57 = vpop.f32.mrf.mxu1 }
 0x18b   :  { %v817_v58 = vpop.f32.mrf.mxu0 }
 0x18c   :  { %v818_v63 = vadd.f32 %v817_v58, %v746_v55 }
 0x18d   :  { %v888_v59 = vpop.f32.mrf.mxu1  ;;  %v819_v60 = vpop.f32.mrf.mxu0 }
 0x18e   :  { %v820_v17 = vadd.f32 %v819_v60, %v748_v57  ;;  %v889_v4 = vadd.f32 %v888_v59, %v818_v63 }
 0x18f   :  { %v890_v61 = vpop.f32.mrf.mxu1 }
 0x190   :  { %v1105_v13 = vand.u32 2147483647, %v889_v4  ;;  %v891_v14 = vadd.f32 %v890_v61, %v820_v17 }
 0x192   :  { %v1109_v19 = vadd.f32 %v1108_v18, %v1105_v13  ;;  %v1106_v20 = vand.u32 2147483647, %v891_v14 }
 0x194   :  { %v1110_v27 = vadd.f32 %v1109_v19, %v1106_v20 }
 0x1ad   :  { %v1171_v1 = vpop.f32.mrf.mxu0 }
 0x1ae   :  { %v1206_v21 = vpop.f32.mrf.mxu1 }
 0x1af   :  { %v1172_v5 = vpop.f32.mrf.mxu0 }
 0x1b0   :  { %v1207_v7 = vpop.f32.mrf.mxu1  ;;  %v1173_v15 = vadd.f32 %v1172_v5, %v1171_v1 }
 0x1b1   :  { %v1208_v16 = vadd.f32 %v1207_v7, %v1206_v21 }
 0x1b3   :  { %v1030_v22 = vadd.f32 %v1208_v16, %v1173_v15 }
 0x1ce   :  { %v1099_v23 = vpop.f32.mrf.mxu0 }
 0x1cf   :  { %v1100_v24 = vadd.f32 %v1099_v23, %v1030_v22 }
 0x1d0   :  { %v1260_v25 = vpop.f32.mrf.mxu0 }
 0x1d1   :  { %v1107_v26 = vand.u32 2147483647, %v1100_v24 }
 0x1d3   :  { %v1111_v28 = vadd.f32 %v1110_v27, %v1107_v26 }
 0x1d5   :  { %1112 = vadd.xlane.f32.xlu0 %v1111_v28 }
 0x25e   :  { %v1113_v29 = vpop.xlane.xlu0 %1112 }
 0x25f   :  { %v1114_v30 = vrot.slane %v1113_v29, 4 }
 0x261   :  { %v1115_v31 = vadd.f32 %v1114_v30, %v1113_v29 }
 0x263   :  { %v1116_v32 = vrot.slane %v1115_v31, 2 }
 0x265   :  { %v1117_v33 = vadd.f32 %v1116_v32, %v1115_v31 }
 0x267   :  { %v1118_v34 = vrot.slane %v1117_v33, 1 }
 0x269   :  { %v1119_v35 = vadd.f32 %v1118_v34, %v1117_v33 }
 0x26b   :  { %1261 = vpush %v1119_v35 }
 0x29c   :  { %s1262_s28 = spop %1261 }
 0x29d   :  { %v1121_v36 = vstv %s1262_s28 }
 0x29e   :  { %1122 = vst [vmem:[#allocation8] sm:$0xff] %v1121_v36 }
 0x29f   :  { %1342 = shalt.err (!%p1339_p5)
}
 0x2a0   :  { %1132 = dma.vmem_to_hbm [thread:$0]  %s1130_s2, 128, %s1444_s3, [#allocation4]  }
 0x2a1   :  { %1355 = dma.done.wait [#allocation4], 128  }
 0x2a2   :  { %1356 = vsyncadd [#allocation4], 4294967168 }
 0x2a3   :  { %1136 = vsyncpa [#allocation3], 1 }
 0x2a4   :  { %1137 = vsyncpa [#allocation6], 1 }
 0x2a5   :  { %1138 = vsyncpa [#allocation4], 1 }

</bundles_post_ra>
